<compile_context>
chip_gen: v6e
topology: v6e:2x2x1
jax: 0.10.0
libtpu: 0.0.40
codegen_flags: <defaults>
</compile_context>

<pallas_src>
import math
from functools import partial

import jax
import jax.numpy as jnp
from jax.experimental import pallas as pl
from jax.experimental.pallas import tpu as pltpu


def _round_up(v, m):
    return ((v + m - 1) // m) * m


_INV_SQRT2 = 0.7071067811865476  # 1/sqrt(2): multiply instead of per-elem divide


def _gelu(x, approximate=False):
    if approximate:
        # tanh form: transcendental goes to the (otherwise idle) EUP slot.
        return jax.nn.gelu(x, approximate=True)
    # PyTorch F.gelu default is the exact (erf-based) GELU.
    return 0.5 * x * (1.0 + jax.lax.erf(x * _INV_SQRT2))


# ---------------------------------------------------------------------------
# Fused kernel: all layers for `block_b` graphs per grid step.
#   refs = (x, adj, mask, w_0, b_0, ..., w_{L-1}, b_{L-1}, out)
#     x    : (BB, Np, Din0)          f32
#     adj  : (BB, Np, Np)            bf16 or f32 (0/1/2-valued -> bf16 exact)
#     mask : (BB, Np, 1)             f32
#     w_l  : (Din_l, DoutPad_l)      f32, pre-transposed (h @ w_l == h @ W_l.T)
#     b_l  : (1, DoutPad_l)          f32
#     out  : (BB, Np, DoutPad_last)
# ---------------------------------------------------------------------------
def _gcn_fused_kernel(*refs, num_layers, block_b, n_pad, approximate_gelu):
    x_ref, adj_ref, mask_ref = refs[0], refs[1], refs[2]
    wb = refs[3:3 + 2 * num_layers]
    out_ref = refs[3 + 2 * num_layers]

    adj = adj_ref[...].astype(jnp.float32)        # (BB, Np, Np)
    mask = mask_ref[...].astype(jnp.float32)      # (BB, Np, 1)

    # Row normalization folded with the node mask into one post-agg scale
    # (XLU reduce, essentially free; no separate normalization pass).
    rowsum = jnp.sum(adj, axis=-1, keepdims=True)
    inv = 1.0 / rowsum                            # matches pow(rowsum, -1)
    inv = jnp.where(jnp.isinf(inv), 0.0, inv)     # D_hat[isinf] = 0
    scale = inv * mask                            # (BB, Np, 1)

    h = x_ref[...].astype(jnp.float32)            # (BB, Np, Din0)
    for l in range(num_layers):                   # static unroll (L known)
        w = wb[2 * l][...]                        # (Din_l, DoutPad_l)
        b = wb[2 * l + 1][...]                    # (1, DoutPad_l)
        din, dout = w.shape
        # Dense transform over all BB*Np node rows at once: folds the graphs
        # into the MXU M dimension instead of BB matmuls with M = Np.
        p = jnp.dot(h.reshape(block_b * n_pad, din), w,
                    preferred_element_type=jnp.float32) + b
        p = p.reshape(block_b, n_pad, dout)
        # Per-graph neighbourhood aggregation (batched MXU matmul).
        a = jnp.einsum("bnm,bmo->bno", adj, p,
                       preferred_element_type=jnp.float32)
        h = _gelu(a * scale, approximate_gelu)

    out_ref[...] = h.astype(out_ref.dtype)


# ---------------------------------------------------------------------------
# One-time parameter packing (hoisted out of the per-call forward).
# ---------------------------------------------------------------------------
def prepare_gcn_params(params, input_dim):
    """params: list of (W, b) with W: (D_out, D_in) like nn.Linear.weight.
    Pads each layer independently: only the output/lane dim is rounded up to
    128; the contracting dim is the true input_dim for layer 0 and the
    previous layer's padded width afterwards (zero rows -> exact).
    Returns (flat list [w0, b0, w1, b1, ...], true output_dim)."""
    packed = []
    din_prev = input_dim
    out_dim = None
    for (w, b) in params:
        dout, din = w.shape
        assert din <= din_prev, (din, din_prev)
        dout_pad = _round_up(dout, 128)
        w_p = jnp.zeros((din_prev, dout_pad), jnp.float32)
        w_p = w_p.at[:din, :dout].set(jnp.asarray(w, jnp.float32).T)
        b_p = jnp.zeros((1, dout_pad), jnp.float32)
        b_p = b_p.at[0, :dout].set(jnp.asarray(b, jnp.float32))
        packed += [w_p, b_p]
        din_prev = dout_pad
        out_dim = dout
    return packed, out_dim


def _choose_block_batch(batch, n_pad, row_target=256):
    """Largest divisor of `batch` whose folded row count (bb*Np) stays under
    row_target, preferring >= 2 grid steps so both v7x TensorCores get work."""
    divisors = [d for d in range(1, batch + 1) if batch % d == 0]
    cands = [d for d in divisors if d * n_pad <= row_target] or [1]
    two_step = [d for d in cands if batch // d >= 2]
    return max(two_step) if two_step else max(cands)


# ---------------------------------------------------------------------------
# Forward wrapper.
# ---------------------------------------------------------------------------
def gcn_forward(x, mask, adj, packed_params, output_dim, *, block_batch=None,
                approximate_gelu=False):
    """x: (B, N, Din), mask: (B, N), adj: (B, N, N).
    adj may be bfloat16 (exact for 0/1-valued adjacency; halves HBM traffic)."""
    B, N, din0 = x.shape
    L = len(packed_params) // 2
    assert packed_params[0].shape[0] == din0, "input_dim mismatch"
    dout_pad_last = packed_params[-1].shape[-1]

    # Pad the node dim to a sublane multiple so in-kernel (BB*Np, D) reshapes
    # are tile-aligned.  Padded adj rows/cols are zero -> rowsum 0 -> scale 0
    # -> padded output rows are exactly zero.
    n_pad = _round_up(N, 8)
    if n_pad != N:
        x = jnp.pad(x, ((0, 0), (0, n_pad - N), (0, 0)))
        mask = jnp.pad(mask, ((0, 0), (0, n_pad - N)))
        adj = jnp.pad(adj, ((0, 0), (0, n_pad - N), (0, n_pad - N)))
    mask3 = mask[..., None].astype(jnp.float32)

    bb = block_batch if block_batch is not None else _choose_block_batch(B, n_pad)
    assert B % bb == 0, (B, bb)

    in_specs = [
        pl.BlockSpec((bb, n_pad, din0), lambda i: (i, 0, 0)),    # x
        pl.BlockSpec((bb, n_pad, n_pad), lambda i: (i, 0, 0)),   # adj
        pl.BlockSpec((bb, n_pad, 1), lambda i: (i, 0, 0)),       # mask
    ]
    # Grid-invariant weights/biases: constant block index -> DMA'd once, never
    # re-fetched across grid steps.  (All 2-D, hence the constant (0, 0).)
    for p in packed_params:
        in_specs.append(pl.BlockSpec(p.shape, lambda i: (0, 0)))

    kernel = partial(_gcn_fused_kernel, num_layers=L, block_b=bb, n_pad=n_pad,
                     approximate_gelu=approximate_gelu)

    out_p = pl.pallas_call(
        kernel,
        out_shape=jax.ShapeDtypeStruct((B, n_pad, dout_pad_last), x.dtype),
        grid_spec=pltpu.PrefetchScalarGridSpec(
            num_scalar_prefetch=0,
            grid=(B // bb,),
            in_specs=in_specs,
            out_specs=pl.BlockSpec((bb, n_pad, dout_pad_last),
                                   lambda i: (i, 0, 0)),
        ),
        compiler_params=pltpu.CompilerParams(
            dimension_semantics=("parallel",)),    # megacore on v7x
    )(x, adj, mask3, *packed_params)

    # TODO(synk): for repeated inference, keep the padded (B, Np, DoutPad)
    # output resident and slice lazily at the consumer instead of here.
    return out_p[:, :N, :output_dim]


def init_params(key, layer_num, input_dim, hidden_dim, output_dim):
    params = []
    dims = []
    for i in range(layer_num):
        if i == layer_num - 1:
            dims.append((hidden_dim, output_dim))
        elif i == 0:
            dims.append((input_dim, hidden_dim))
        else:
            dims.append((hidden_dim, hidden_dim))
    for (din, dout) in dims:
        key, kw, kb = jax.random.split(key, 3)
        bound = 1.0 / math.sqrt(din)
        w = jax.random.uniform(kw, (dout, din), jnp.float32, -bound, bound)
        b = jax.random.uniform(kb, (dout,), jnp.float32, -bound, bound)
        params.append((w, b))
    return params


if __name__ == "__main__":
    B, N = 4, 16
    layer_num, input_dim, hidden_dim, output_dim = 3, 8, 32, 16

    key = jax.random.PRNGKey(0)
    kx, ka, km, kp = jax.random.split(key, 4)

    x = jax.random.normal(kx, (B, N, input_dim), jnp.float32)
    adj = (jax.random.uniform(ka, (B, N, N)) > 0.5).astype(jnp.float32)
    adj = adj + jnp.eye(N, dtype=jnp.float32)[None]        # self loops -> {0,1,2}
    mask = (jax.random.uniform(km, (B, N)) > 0.2).astype(jnp.float32)

    params = init_params(kp, layer_num, input_dim, hidden_dim, output_dim)
    packed, out_dim = prepare_gcn_params(params, input_dim)   # hoisted: once

    # bf16 adjacency: exact for {0,1,2} values, halves its HBM/VMEM footprint
    # (cast back to f32 inside the kernel so matmuls stay f32-exact).
    adj_bf16 = adj.astype(jnp.bfloat16)

    out = gcn_forward(x, mask, adj_bf16, packed, out_dim)
    jax.block_until_ready(out)

    # Pure-JAX reference of the original module's math (eval mode).
    rowsum = jnp.sum(adj, axis=-1, keepdims=True)
    inv = jnp.where(jnp.isinf(1.0 / rowsum), 0.0, 1.0 / rowsum)
    adj_n = adj * inv
    xr = x
    for (w, b) in params:
        h = jnp.einsum("bnd,od->bno", xr, w) + b
        h = jnp.einsum("bnm,bmo->bno", adj_n, h)
        h = h * mask[..., None]
        xr = 0.5 * h * (1.0 + jax.lax.erf(h / jnp.sqrt(2.0)))

    assert out.shape == xr.shape, f"shape mismatch {out.shape} vs {xr.shape}"
    assert jnp.allclose(out, xr, atol=1e-4, rtol=1e-4), "mismatch vs reference"

    print("KERNEL_OK")
</pallas_src>

<mosaic_0001>
module attributes {stable_mosaic.version = 11 : i64} {
  func.func @_gcn_fused_kernel(%arg0: i32, %arg1: memref<2x16x8xf32, #tpu.memory_space<vmem>>, %arg2: memref<2x16x16xbf16, #tpu.memory_space<vmem>>, %arg3: memref<2x16x1xf32, #tpu.memory_space<vmem>>, %arg4: memref<8x128xf32, #tpu.memory_space<vmem>>, %arg5: memref<1x128xf32, #tpu.memory_space<vmem>>, %arg6: memref<128x128xf32, #tpu.memory_space<vmem>>, %arg7: memref<1x128xf32, #tpu.memory_space<vmem>>, %arg8: memref<128x128xf32, #tpu.memory_space<vmem>>, %arg9: memref<1x128xf32, #tpu.memory_space<vmem>>, %arg10: memref<2x16x128xf32, #tpu.memory_space<vmem>>) attributes {dimension_semantics = [#tpu.dimension_semantics<parallel>], iteration_bounds = array<i64: 2>, scalar_prefetch = 0 : i64, scratch_operands = 0 : i64, tpu.core_type = #tpu.core_type<tc>, window_params = [{transform_indices = @transform_0, window_bounds = array<i64: 2, 16, 8>}, {transform_indices = @transform_1, window_bounds = array<i64: 2, 16, 16>}, {transform_indices = @transform_2, window_bounds = array<i64: 2, 16, 1>}, {pipeline_mode = #tpu.pipeline_mode<synchronous>, transform_indices = @transform_3, window_bounds = array<i64: 8, 128>}, {pipeline_mode = #tpu.pipeline_mode<synchronous>, transform_indices = @transform_4, window_bounds = array<i64: 1, 128>}, {pipeline_mode = #tpu.pipeline_mode<synchronous>, transform_indices = @transform_5, window_bounds = array<i64: 128, 128>}, {pipeline_mode = #tpu.pipeline_mode<synchronous>, transform_indices = @transform_6, window_bounds = array<i64: 1, 128>}, {pipeline_mode = #tpu.pipeline_mode<synchronous>, transform_indices = @transform_7, window_bounds = array<i64: 128, 128>}, {pipeline_mode = #tpu.pipeline_mode<synchronous>, transform_indices = @transform_8, window_bounds = array<i64: 1, 128>}, {transform_indices = @transform_9, window_bounds = array<i64: 2, 16, 128>}]} {
    %c0 = arith.constant 0 : index
    %c0_0 = arith.constant 0 : index
    %c0_1 = arith.constant 0 : index
    %0 = vector.load %arg2[%c0, %c0_0, %c0_1] : memref<2x16x16xbf16, #tpu.memory_space<vmem>>, vector<2x16x16xbf16>
    %1 = arith.extf %0 : vector<2x16x16xbf16> to vector<2x16x16xf32>
    %c0_2 = arith.constant 0 : index
    %c0_3 = arith.constant 0 : index
    %c0_4 = arith.constant 0 : index
    %2 = vector.load %arg3[%c0_2, %c0_3, %c0_4] : memref<2x16x1xf32, #tpu.memory_space<vmem>>, vector<2x16x1xf32>
    %cst = arith.constant dense<0.000000e+00> : vector<2x16xf32>
    %3 = vector.multi_reduction <add>, %1, %cst [2] : vector<2x16x16xf32> to vector<2x16xf32>
    %4 = vector.shape_cast %3 : vector<2x16xf32> to vector<2x16x1xf32>
    %cst_5 = arith.constant 1.000000e+00 : f32
    %5 = vector.broadcast %cst_5 : f32 to vector<2x16x1xf32>
    %6 = arith.divf %5, %4 : vector<2x16x1xf32>
    %7 = math.absf %6 : vector<2x16x1xf32>
    %cst_6 = arith.constant 0x7F800000 : f32
    %8 = vector.broadcast %cst_6 : f32 to vector<2x16x1xf32>
    %9 = arith.cmpf oeq, %7, %8 : vector<2x16x1xf32>
    %cst_7 = arith.constant 0.000000e+00 : f32
    %10 = vector.broadcast %cst_7 : f32 to vector<2x16x1xf32>
    %11 = arith.select %9, %10, %6 : vector<2x16x1xi1>, vector<2x16x1xf32>
    %12 = arith.mulf %11, %2 : vector<2x16x1xf32>
    %c0_8 = arith.constant 0 : index
    %c0_9 = arith.constant 0 : index
    %c0_10 = arith.constant 0 : index
    %13 = vector.load %arg1[%c0_8, %c0_9, %c0_10] : memref<2x16x8xf32, #tpu.memory_space<vmem>>, vector<2x16x8xf32>
    %c0_11 = arith.constant 0 : index
    %c0_12 = arith.constant 0 : index
    %14 = vector.load %arg4[%c0_11, %c0_12] : memref<8x128xf32, #tpu.memory_space<vmem>>, vector<8x128xf32>
    %c0_13 = arith.constant 0 : index
    %c0_14 = arith.constant 0 : index
    %15 = vector.load %arg5[%c0_13, %c0_14] : memref<1x128xf32, #tpu.memory_space<vmem>>, vector<1x128xf32>
    %16 = vector.shape_cast %13 : vector<2x16x8xf32> to vector<32x8xf32>
    %cst_15 = arith.constant dense<0.000000e+00> : vector<32x128xf32>
    %17 = tpu.matmul %16, %14, %cst_15 {dimension_numbers = #tpu.dot_dimension_numbers<[1], [0], [0], [1], [0, 0, 1, 1], [], []>} : vector<32x8xf32>, vector<8x128xf32>, vector<32x128xf32> -> vector<32x128xf32>
    %18 = vector.broadcast %15 : vector<1x128xf32> to vector<32x128xf32>
    %19 = arith.addf %17, %18 : vector<32x128xf32>
    %20 = vector.shape_cast %19 : vector<32x128xf32> to vector<2x16x128xf32>
    "tpu.trace_start"() <{level = 10 : i32, message = "bnm,bmo->bno"}> : () -> ()
    %cst_16 = arith.constant dense<0.000000e+00> : vector<2x16x128xf32>
    %21 = tpu.matmul %1, %20, %cst_16 {dimension_numbers = #tpu.dot_dimension_numbers<[2], [1], [1], [2], [0, 0, 0, 1, 1, 2], [0], [0]>} : vector<2x16x16xf32>, vector<2x16x128xf32>, vector<2x16x128xf32> -> vector<2x16x128xf32>
    "tpu.trace_stop"() : () -> ()
    %22 = vector.broadcast %12 : vector<2x16x1xf32> to vector<2x16x128xf32>
    %23 = arith.mulf %21, %22 : vector<2x16x128xf32>
    %cst_17 = arith.constant 5.000000e-01 : f32
    %24 = vector.broadcast %cst_17 : f32 to vector<2x16x128xf32>
    %25 = arith.mulf %24, %23 : vector<2x16x128xf32>
    %cst_18 = arith.constant 0.707106769 : f32
    %26 = vector.broadcast %cst_18 : f32 to vector<2x16x128xf32>
    %27 = arith.mulf %23, %26 : vector<2x16x128xf32>
    %28 = math.erf %27 : vector<2x16x128xf32>
    %cst_19 = arith.constant 1.000000e+00 : f32
    %29 = vector.broadcast %cst_19 : f32 to vector<2x16x128xf32>
    %30 = arith.addf %29, %28 : vector<2x16x128xf32>
    %31 = arith.mulf %25, %30 : vector<2x16x128xf32>
    %c0_20 = arith.constant 0 : index
    %c0_21 = arith.constant 0 : index
    %32 = vector.load %arg6[%c0_20, %c0_21] : memref<128x128xf32, #tpu.memory_space<vmem>>, vector<128x128xf32>
    %c0_22 = arith.constant 0 : index
    %c0_23 = arith.constant 0 : index
    %33 = vector.load %arg7[%c0_22, %c0_23] : memref<1x128xf32, #tpu.memory_space<vmem>>, vector<1x128xf32>
    %34 = vector.shape_cast %31 : vector<2x16x128xf32> to vector<32x128xf32>
    %cst_24 = arith.constant dense<0.000000e+00> : vector<32x128xf32>
    %35 = tpu.matmul %34, %32, %cst_24 {dimension_numbers = #tpu.dot_dimension_numbers<[1], [0], [0], [1], [0, 0, 1, 1], [], []>} : vector<32x128xf32>, vector<128x128xf32>, vector<32x128xf32> -> vector<32x128xf32>
    %36 = vector.broadcast %33 : vector<1x128xf32> to vector<32x128xf32>
    %37 = arith.addf %35, %36 : vector<32x128xf32>
    %38 = vector.shape_cast %37 : vector<32x128xf32> to vector<2x16x128xf32>
    "tpu.trace_start"() <{level = 10 : i32, message = "bnm,bmo->bno"}> : () -> ()
    %cst_25 = arith.constant dense<0.000000e+00> : vector<2x16x128xf32>
    %39 = tpu.matmul %1, %38, %cst_25 {dimension_numbers = #tpu.dot_dimension_numbers<[2], [1], [1], [2], [0, 0, 0, 1, 1, 2], [0], [0]>} : vector<2x16x16xf32>, vector<2x16x128xf32>, vector<2x16x128xf32> -> vector<2x16x128xf32>
    "tpu.trace_stop"() : () -> ()
    %40 = vector.broadcast %12 : vector<2x16x1xf32> to vector<2x16x128xf32>
    %41 = arith.mulf %39, %40 : vector<2x16x128xf32>
    %cst_26 = arith.constant 5.000000e-01 : f32
    %42 = vector.broadcast %cst_26 : f32 to vector<2x16x128xf32>
    %43 = arith.mulf %42, %41 : vector<2x16x128xf32>
    %cst_27 = arith.constant 0.707106769 : f32
    %44 = vector.broadcast %cst_27 : f32 to vector<2x16x128xf32>
    %45 = arith.mulf %41, %44 : vector<2x16x128xf32>
    %46 = math.erf %45 : vector<2x16x128xf32>
    %cst_28 = arith.constant 1.000000e+00 : f32
    %47 = vector.broadcast %cst_28 : f32 to vector<2x16x128xf32>
    %48 = arith.addf %47, %46 : vector<2x16x128xf32>
    %49 = arith.mulf %43, %48 : vector<2x16x128xf32>
    %c0_29 = arith.constant 0 : index
    %c0_30 = arith.constant 0 : index
    %50 = vector.load %arg8[%c0_29, %c0_30] : memref<128x128xf32, #tpu.memory_space<vmem>>, vector<128x128xf32>
    %c0_31 = arith.constant 0 : index
    %c0_32 = arith.constant 0 : index
    %51 = vector.load %arg9[%c0_31, %c0_32] : memref<1x128xf32, #tpu.memory_space<vmem>>, vector<1x128xf32>
    %52 = vector.shape_cast %49 : vector<2x16x128xf32> to vector<32x128xf32>
    %cst_33 = arith.constant dense<0.000000e+00> : vector<32x128xf32>
    %53 = tpu.matmul %52, %50, %cst_33 {dimension_numbers = #tpu.dot_dimension_numbers<[1], [0], [0], [1], [0, 0, 1, 1], [], []>} : vector<32x128xf32>, vector<128x128xf32>, vector<32x128xf32> -> vector<32x128xf32>
    %54 = vector.broadcast %51 : vector<1x128xf32> to vector<32x128xf32>
    %55 = arith.addf %53, %54 : vector<32x128xf32>
    %56 = vector.shape_cast %55 : vector<32x128xf32> to vector<2x16x128xf32>
    "tpu.trace_start"() <{level = 10 : i32, message = "bnm,bmo->bno"}> : () -> ()
    %cst_34 = arith.constant dense<0.000000e+00> : vector<2x16x128xf32>
    %57 = tpu.matmul %1, %56, %cst_34 {dimension_numbers = #tpu.dot_dimension_numbers<[2], [1], [1], [2], [0, 0, 0, 1, 1, 2], [0], [0]>} : vector<2x16x16xf32>, vector<2x16x128xf32>, vector<2x16x128xf32> -> vector<2x16x128xf32>
    "tpu.trace_stop"() : () -> ()
    %58 = vector.broadcast %12 : vector<2x16x1xf32> to vector<2x16x128xf32>
    %59 = arith.mulf %57, %58 : vector<2x16x128xf32>
    %cst_35 = arith.constant 5.000000e-01 : f32
    %60 = vector.broadcast %cst_35 : f32 to vector<2x16x128xf32>
    %61 = arith.mulf %60, %59 : vector<2x16x128xf32>
    %cst_36 = arith.constant 0.707106769 : f32
    %62 = vector.broadcast %cst_36 : f32 to vector<2x16x128xf32>
    %63 = arith.mulf %59, %62 : vector<2x16x128xf32>
    %64 = math.erf %63 : vector<2x16x128xf32>
    %cst_37 = arith.constant 1.000000e+00 : f32
    %65 = vector.broadcast %cst_37 : f32 to vector<2x16x128xf32>
    %66 = arith.addf %65, %64 : vector<2x16x128xf32>
    %67 = arith.mulf %61, %66 : vector<2x16x128xf32>
    %c0_38 = arith.constant 0 : index
    %c0_39 = arith.constant 0 : index
    %c0_40 = arith.constant 0 : index
    %68 = vector.load %arg10[%c0_38, %c0_39, %c0_40] : memref<2x16x128xf32, #tpu.memory_space<vmem>>, vector<2x16x128xf32>
    tpu.vector_store %arg10[%c0_38, %c0_39, %c0_40], %67 {strides = array<i32>} : memref<2x16x128xf32, #tpu.memory_space<vmem>>, vector<2x16x128xf32>,
    return
  }
  func.func @transform_0(%arg0: i32) -> (i32, i32, i32) {
    %c0_i32 = arith.constant 0 : i32
    %c0_i32_0 = arith.constant 0 : i32
    %c0_i32_1 = arith.constant 0 : i32
    return %arg0, %c0_i32, %c0_i32_0 : i32, i32, i32
  }
  func.func @transform_1(%arg0: i32) -> (i32, i32, i32) {
    %c0_i32 = arith.constant 0 : i32
    %c0_i32_0 = arith.constant 0 : i32
    %c0_i32_1 = arith.constant 0 : i32
    return %arg0, %c0_i32, %c0_i32_0 : i32, i32, i32
  }
  func.func @transform_2(%arg0: i32) -> (i32, i32, i32) {
    %c0_i32 = arith.constant 0 : i32
    %c0_i32_0 = arith.constant 0 : i32
    %c0_i32_1 = arith.constant 0 : i32
    return %arg0, %c0_i32, %c0_i32_0 : i32, i32, i32
  }
  func.func @transform_3(%arg0: i32) -> (i32, i32) {
    %c0_i32 = arith.constant 0 : i32
    %c0_i32_0 = arith.constant 0 : i32
    %c0_i32_1 = arith.constant 0 : i32
    return %c0_i32, %c0_i32_0 : i32, i32
  }
  func.func @transform_4(%arg0: i32) -> (i32, i32) {
    %c0_i32 = arith.constant 0 : i32
    %c0_i32_0 = arith.constant 0 : i32
    %c0_i32_1 = arith.constant 0 : i32
    return %c0_i32, %c0_i32_0 : i32, i32
  }
  func.func @transform_5(%arg0: i32) -> (i32, i32) {
    %c0_i32 = arith.constant 0 : i32
    %c0_i32_0 = arith.constant 0 : i32
    %c0_i32_1 = arith.constant 0 : i32
    return %c0_i32, %c0_i32_0 : i32, i32
  }
  func.func @transform_6(%arg0: i32) -> (i32, i32) {
    %c0_i32 = arith.constant 0 : i32
    %c0_i32_0 = arith.constant 0 : i32
    %c0_i32_1 = arith.constant 0 : i32
    return %c0_i32, %c0_i32_0 : i32, i32
  }
  func.func @transform_7(%arg0: i32) -> (i32, i32) {
    %c0_i32 = arith.constant 0 : i32
    %c0_i32_0 = arith.constant 0 : i32
    %c0_i32_1 = arith.constant 0 : i32
    return %c0_i32, %c0_i32_0 : i32, i32
  }
  func.func @transform_8(%arg0: i32) -> (i32, i32) {
    %c0_i32 = arith.constant 0 : i32
    %c0_i32_0 = arith.constant 0 : i32
    %c0_i32_1 = arith.constant 0 : i32
    return %c0_i32, %c0_i32_0 : i32, i32
  }
  func.func @transform_9(%arg0: i32) -> (i32, i32, i32) {
    %c0_i32 = arith.constant 0 : i32
    %c0_i32_0 = arith.constant 0 : i32
    %c0_i32_1 = arith.constant 0 : i32
    return %arg0, %c0_i32, %c0_i32_0 : i32, i32, i32
  }
}

</mosaic_0001>

<bundles_post_ra>
// kernel: tpu_custom_call.1
= control target key start
LH: loop header
LB: loop body
LE: loop exit
PB: predicated region body
PF: predicated region fallthrough
CT: control target
= control target key end

     0   :  { %14 = vsyncpa [#allocation3], 0  ;;  %s2199_s0 = inlined_call_operand.vmem [shape: f32[4,16,8], index: 0, kind: input, shape index: {}]   ;;  %s2200_s1 = inlined_call_operand.vmem [shape: bf16[4,16,16], index: 1, kind: input, shape index: {}]   ;;  %s2201_s2 = inlined_call_operand.vmem [shape: f32[4,16,1], index: 2, kind: input, shape index: {}]   ;;  %s2202_s3 = inlined_call_operand.vmem [shape: f32[8,128], index: 3, kind: input, shape index: {}]   ;;  %s2203_s4 = inlined_call_operand.vmem [shape: f32[1,128], index: 4, kind: input, shape index: {}]   ;;  %s2204_s5 = inlined_call_operand.vmem [shape: f32[128,128], index: 5, kind: input, shape index: {}]   ;;  %s2205_s6 = inlined_call_operand.vmem [shape: f32[1,128], index: 6, kind: input, shape index: {}]   ;;  %s2206_s7 = inlined_call_operand.hbm [shape: f32[128,128], index: 7, kind: input, shape index: {}]   ;;  %s2207_s8 = inlined_call_operand.vmem [shape: f32[1,128], index: 8, kind: input, shape index: {}]   ;;  %s2208_s9 = inlined_call_operand.hbm [shape: f32[4,16,128], index: 9, kind: output, shape index: {}]  }
   0x1   :  { %15 = vsyncpa [#allocation4], 0 }
   0x2   :  { %17 = vsyncpa [#allocation4 + $0x1], 0  ;;  %s1936_s30 = smov 0   ;;  %s1938_s10 = smov 0  }
   0x3   :  { %s1940_s11 = smov 0   ;;  %s1942_s12 = smov 0  }
   0x4 LB: > { %s1957_s13 = sadd.s32 4294967295, %s1877_s12   ;;  %s1448_s14 = sadd.s32 4294967294, %s1877_s12   ;;  %s1877_s12 = sphi %s1942_s12, %s2218_s12   ;;  %s1873_s11 = sphi %s1940_s11, %s2217_s11   ;;  %s1869_s10 = sphi %s1938_s10, %s2216_s10   ;;  %s1865_s30 = sphi %s1936_s30, %s2215_s30  }
   0x5   : > { %s1961_s15 = sadd.s32 1, %s1877_s12   ;;  %s234_s16 = sadd.s32 1, %s1873_s11 }
   0x6   : > { %s231_s17 = ssub.s32 %s1877_s12, %s1961_s15  ;;  %p244_p0 = scmp.ne.s32.totalorder %s1873_s11, %s1869_s10 }
   0x7   : > { %p232_p1 = scmp.eq.s32.totalorder %s231_s17, 0  ;;  %p245_p2 = scmp.eq.s32.totalorder %s1957_s13, 1 }
   0x8   : > { %p250_p3 = scmp.ne.s32.totalorder %s1869_s10, %s1865_s30  ;;  %p251_p4 = scmp.eq.s32.totalorder %s1448_s14, 1 }
   0x9   : > { %s1972_s18 = scalar_select %p232_p1, %s1873_s11, %s234_s16  }
   0xa   : > { %p1974_p5 = por %p245_p2, %p244_p0  ;;  %p1978_p6 = por %p251_p4, %p250_p3 }
   0xb   : > { %p1449_p7 = scmp.ge.s32.totalorder %s1877_s12, 1  ;;  %p258_p8 = scmp.lt.s32.totalorder %s1877_s12, 3 }
   0xc   : > { %s2210_s20 = scalar_select %p1978_p6, 1, 0 }
   0xd   : > { %p1712_p9 = scmp.eq.s32.totalorder %s1957_s13, 0  ;;  %p1985_p10 = pnand %p1449_p7, %p258_p8 }
   0xe   : > { %s1879_s22 = smov [#allocation2]  }
   0xf   : > { %s282_s23 = sshll.u32 %s1879_s22, 4  ;;  %p1704_p11 = pneg %p1985_p10  ;;  %s283_s23 = int_to_ptr.vmem [resolvable:$true] %s282_s23 }
  0x10   : > { %s1798_s24 = scalar_lea.vmem %s283_s23, 2048  ;;  %p1806_p3 = scmp.lt.s32.totalorder %s283_s23, %s283_s23 }
  0x11   : > { %p1705_p12 = pnand %p1712_p9, %p1704_p11  ;;  %p1799_p0 = scmp.ne.s32.totalorder %s283_s23, %s1798_s24 }
  0x12   : > { %p1807_p4 = scmp.lt.s32.totalorder %s1798_s24, %s1798_s24 }
  0x13   : > { %p1789_p13 = pneg %p1705_p12 }
  0x14   : > { %p1808_p6 = por %p1807_p4, %p1806_p3 }
  0x15   : > { %p1801_p1 = pnand %p1799_p0, %p1789_p13 }
  0x17   : > { %p1802_p2 = pneg %p1801_p1 }
  0x19   : > { %p1809_p7 = pnand %p1808_p6, %p1802_p2 }
  0x1b   : > { %1812 = shalt.err (!%p1809_p7)
}
  0x1c   : > { %s1880_s25 = smov 128   ;;  %s1881_s26 = smov 8  }
  0x1d   : > { %1707 = dma.hbm_to_vmem [thread:$0]  (!%p1705_p12), %s2206_s7, 2048, %s283_s23, [#allocation3], %s1880_s25, %s1880_s25, %s1881_s26  }
  0x1e   : > { %331 = sbr.rel (%p1985_p10) target bundleno = 1312 (0x520), region = 56 }
  0x23   : > { %1856 = dma.done.wait (%p1712_p9), [#allocation3], 2048  }
  0x24   : > { %1858 = vsyncadd (%p1712_p9), [#allocation3], 4294965248  ;;  %s1455_s29 = sshll.u32 %s1957_s13, 1  ;;  %vm463_vm0 = vcmask 64512   ;;  %v455_v0 = vld [vmem:[%s2202_s3] sm:$0xff]  ;;  %vm414_vm1 = vcmask 130048  }
  0x25   : > { %p381_p8 = scmp.lt.s32.totalorder %s1455_s29, 3  ;;  %1572 = vmatprep.subr.mxu0 %v455_v0  ;;  %v1882_v15 = vmov 0   ;;  %v782_v16 = vld [vmem:[%s2204_s5 + $0x78] sm:$0xff]  ;;  %v781_v34 = vld [vmem:[%s2204_s5 + $0x70] sm:$0xff]  ;;  %v780_v35 = vld [vmem:[%s2204_s5 + $0x68] sm:$0xff]  ;;  %s1493_s25 = sshll.u32 %s1957_s13, 9 }
  0x26   : > { %1573 = vmatpush3.msra.mxu0 %v455_v0  ;;  %1754 = vset.pattern.permute.xlu1 %v1882_v15  ;;  %v1464_v44 = vld [vmem:[%s2203_s4] ss:$0 sm:$0xff]  ;;  %v778_v54 = vld [vmem:[%s2204_s5 + $0x58] sm:$0xff]  ;;  %v777_v55 = vld [vmem:[%s2204_s5 + $0x50] sm:$0xff]  ;;  %s2157_s28 = scalar_lea.hbm %s2208_s9, %s1493_s25  ;;  %s1883_s17 = smov [#allocation5]  }
  0x27   : > { %s2220_s29 = smov (!%p381_p8, %s1455_s29), 3  ;;  %1753 = vset.pattern.permute.xlu0 %v1882_v15  ;;  %1594 = vmatprep.subr.mxu0 %v782_v16  ;;  %v779_v53 = vld [vmem:[%s2204_s5 + $0x60] sm:$0xff]  ;;  %v776_v56 = vld [vmem:[%s2204_s5 + $0x48] sm:$0xff]  ;;  %v774_v58 = vld [vmem:[%s2204_s5 + $0x38] sm:$0xff]  ;;  %s1817_s21 = sshll.u32 %s1883_s17, 4  ;;  %s1818_s21 = int_to_ptr.vmem [resolvable:$false] %s1817_s21 }
  0x28   : > { %s1489_s14 = sshll.u32 %s2220_s29, 4  ;;  %s1490_s16 = sshll.u32 %s2220_s29, 3  ;;  %v775_v57 = vld [vmem:[%s2204_s5 + $0x40] sm:$0xff]  ;;  %v773_v59 = vld [vmem:[%s2204_s5 + $0x30] sm:$0xff]  ;;  %v772_v60 = vld [vmem:[%s2204_s5 + $0x28] sm:$0xff] }
  0x29   : > { %s385_s22 = scalar_lea.vmem %s2199_s0, %s1489_s14  ;;  %s392_s27 = scalar_lea.vmem %s2200_s1, %s1490_s16  ;;  %v771_v61 = vld [vmem:[%s2204_s5 + $0x20] sm:$0xff]  ;;  %v770_v62 = vld [vmem:[%s2204_s5 + $0x18] sm:$0xff]  ;;  %v769_v63 = vld [vmem:[%s2204_s5 + $0x10] sm:$0xff] }
  0x2a   : > { %v451_v1 = vld [vmem:[%s385_s22] sm:$0xff]  ;;  %v452_v2 = vld [vmem:[%s385_s22 + $0x8] sm:$0xff]  ;;  %v453_v3 = vld [vmem:[%s385_s22 + $0x10] sm:$0xff]  ;;  %s377_s29 = sand.u32 1, %s1869_s10  }
  0x2b   : > { %1574 = vmatprep.mubr.msk.f32.mxu0 %vm463_vm0, %v451_v1  ;;  %v1495_v4 = vld [vmem:[%s392_s27] sm:$0xff]   ;;  %v1502_v7 = vld [vmem:[%s392_s27 + $0x8] sm:$0xff]   ;;  %v454_v10 = vld [vmem:[%s385_s22 + $0x18] sm:$0xff]  ;;  %s399_s22 = scalar_lea.vmem %s2201_s2, %s1489_s14  ;;  %s1454_s23 = sshll.u32 %s377_s29, 5 }
  0x2c   : > { %v2019_v5 = vunpack.c.l.bf16 %v1495_v4  ;;  %v2021_v6 = vunpack.c.h.bf16 %v1495_v4  ;;  %1575 = vmatmul.mubr.msk.f32.vlgmr.msra.gmra.mxu0 %vm463_vm0, %v452_v2  ;;  %v2024_v8 = vunpack.c.l.bf16 %v1502_v7  ;;  %v2026_v9 = vunpack.c.h.bf16 %v1502_v7  ;;  %v410_v24 = vld [vmem:[%s399_s22] sm:$0xff]  ;;  %v411_v32 = vld [vmem:[%s399_s22 + $0x8] sm:$0xff]  ;;  %v412_v37 = vld [vmem:[%s399_s22 + $0x10] sm:$0xff]  ;;  %s379_s14 = scalar_lea.vmem [#allocation5], %s1454_s23  ;;  %s2159_s16 = scalar_lea.sflag [#allocation4], %s377_s29 }
  0x2d   : > { %1577 = vmatprep.mubr.msk.f32.mxu0 %vm463_vm0, %v453_v3  ;;  %1595 = vmatpush3.msra.mxu0 %v782_v16  ;;  %v413_v41 = vld [vmem:[%s399_s22 + $0x18] sm:$0xff]  ;;  %v768_v0 = vld [vmem:[%s2204_s5 + $0x8] sm:$0xff]  ;;  %v767_v1 = vld [vmem:[%s2204_s5] sm:$0xff]  ;;  %s1350_s24 = sshll.u32 %s379_s14, 4  ;;  %s1819_s22 = scalar_lea.vmem %s1818_s21, 1024  ;;  %s2152_s24 = int_to_ptr.vmem [resolvable:$true] %s1350_s24 }
  0x2e   : > { %v415_v11 = vsel %vm414_vm1, %v2019_v5, 0.0  ;;  %1584 = vmatprep.mubr.msk.f32.mxu1 %vm414_vm1, %v2019_v5  ;;  %v421_v12 = vsel %vm414_vm1, %v2024_v8, 0.0  ;;  %v418_v13 = vsel %vm414_vm1, %v2021_v6, 0.0  ;;  %v424_v14 = vsel %vm414_vm1, %v2026_v9, 0.0  ;;  %1596 = vmatprep.subr.mxu0 %v781_v34  ;;  %s1813_s13 = scalar_lea.vmem %s2152_s24, 512  ;;  %p1820_p11 = scmp.lt.s32.totalorder %s2152_s24, %s1818_s21 }
  0x2f   : > { %416 = vadd.xlane.f32.xlu0 %v415_v11  ;;  %422 = vadd.xlane.f32.xlu1 %v421_v12  ;;  %p1814_p6 = scmp.ne.s32.totalorder %s2152_s24, %s1813_s13  ;;  %p1821_p12 = scmp.lt.s32.totalorder %s1819_s22, %s1813_s13 }
  0x30   : > { %1578 = vmatmul.mubr.msk.f32.gmra.mxu0 %vm463_vm0, %v454_v10 }
  0x31   : > { %1597 = vmatpush3.msra.mxu0 %v781_v34  ;;  %p1815_p9 = pnand %p1814_p6, %p1974_p5  ;;  %p1822_p13 = por %p1821_p12, %p1820_p11 }
  0x32   : > { %1598 = vmatprep.subr.mxu0 %v780_v35 }
  0x33   : > { %419 = vadd.xlane.f32.xlu0 %v418_v13  ;;  %425 = vadd.xlane.f32.xlu1 %v424_v14  ;;  %p1816_p10 = pneg %p1815_p9 }
  0x34   : > { %1599 = vmatpush3.msra.mxu0 %v780_v35 }
  0x35   : > { %1600 = vmatprep.subr.mxu0 %v779_v53  ;;  %p1823_p0 = pnand %p1822_p13, %p1816_p10 }
  0x36   : > { %1601 = vmatpush3.msra.mxu0 %v779_v53  ;;  %v1057_v53 = vld [vmem:[#allocation2 + $0x40] sm:$0xff] }
  0x37   : > { %1602 = vmatprep.subr.mxu0 %v778_v54 }
  0x38   : > { %1603 = vmatpush3.msra.mxu0 %v778_v54  ;;  %v1056_v54 = vld [vmem:[#allocation2 + $0x38] sm:$0xff] }
  0x39   : > { %1604 = vmatprep.subr.mxu0 %v777_v55 }
  0x3a   : > { %1605 = vmatpush3.msra.mxu0 %v777_v55  ;;  %v1055_v55 = vld [vmem:[#allocation2 + $0x30] sm:$0xff] }
  0x3b   : > { %1606 = vmatprep.subr.mxu0 %v776_v56 }
  0x3c   : > { %1607 = vmatpush3.msra.mxu0 %v776_v56  ;;  %v1054_v56 = vld [vmem:[#allocation2 + $0x28] sm:$0xff] }
  0x3d   : > { %1608 = vmatprep.subr.mxu0 %v775_v57 }
  0x3e   : > { %1609 = vmatpush3.msra.mxu0 %v775_v57  ;;  %v1053_v57 = vld [vmem:[#allocation2 + $0x20] sm:$0xff] }
  0x3f   : > { %1610 = vmatprep.subr.mxu0 %v774_v58 }
  0x40   : > { %1611 = vmatpush3.msra.mxu0 %v774_v58  ;;  %v1052_v58 = vld [vmem:[#allocation2 + $0x18] sm:$0xff] }
  0x41   : > { %1612 = vmatprep.subr.mxu0 %v773_v59 }
  0x42   : > { %1613 = vmatpush3.msra.mxu0 %v773_v59  ;;  %v1051_v59 = vld [vmem:[#allocation2 + $0x10] sm:$0xff] }
  0x43   : > { %1614 = vmatprep.subr.mxu0 %v772_v60 }
  0x44   : > { %1615 = vmatpush3.msra.mxu0 %v772_v60  ;;  %v1050_v60 = vld [vmem:[#allocation2 + $0x8] sm:$0xff] }
  0x45   : > { %1616 = vmatprep.subr.mxu0 %v771_v61 }
  0x46   : > { %1617 = vmatpush3.msra.mxu0 %v771_v61  ;;  %v1049_v61 = vld [vmem:[#allocation2] sm:$0xff] }
  0x47   : > { %1618 = vmatprep.subr.mxu0 %v770_v62 }
  0x48   : > { %1619 = vmatpush3.msra.mxu0 %v770_v62 }
  0x49   : > { %1620 = vmatprep.subr.mxu0 %v769_v63 }
  0x4a   : > { %1621 = vmatpush3.msra.mxu0 %v769_v63 }
  0x4b   : > { %1622 = vmatprep.subr.mxu0 %v768_v0 }
  0x4c   : > { %1623 = vmatpush3.msra.mxu0 %v768_v0 }
  0x4d   : > { %1624 = vmatprep.subr.mxu0 %v767_v1 }
  0x4e   : > { %1625 = vmatpush3.msra.mxu0 %v767_v1 }
  0xb8   : > { %v417_v17 = vpop.xlane.xlu0 %416  ;;  %v423_v18 = vpop.xlane.xlu1 %422 }
  0xb9   : > { %1755 = vrcp.f32 %v417_v17 }
  0xba   : > { %1757 = vrcp.f32 %v423_v18 }
  0xbc   : > { %v420_v19 = vpop.xlane.xlu0 %419  ;;  %v426_v20 = vpop.xlane.xlu1 %425 }
  0xbd   : > { %1759 = vrcp.f32 %v420_v19 }
  0xbe   : > { %1761 = vrcp.f32 %v426_v20 }
  0xc6   : > { %v1756_v21 = vpop.eup %1755 }
  0xc7   : > { %v1758_v22 = vpop.eup %1757  ;;  %v435_v23 = vand.u32 2147483647, %v1756_v21 }
  0xc8   : > { %v437_v25 = vand.u32 2147483647, %v1758_v22 }
  0xc9   : > { %vm439_vm2 = vcmp.eq.f32.partialorder %v435_v23, inf }
  0xca   : > { %v1760_v26 = vpop.eup %1759  ;;  %v443_v27 = vsel %vm439_vm2, 0.0, %v1756_v21  ;;  %vm2048_vm3 = vcmp.eq.f32.partialorder %v437_v25, inf }
  0xcb   : > { %v1762_v28 = vpop.eup %1761  ;;  %v436_v29 = vand.u32 2147483647, %v1760_v26  ;;  %v447_v30 = vmul.f32 %v443_v27, %v410_v24  ;;  %v445_v38 = vsel %vm2048_vm3, 0.0, %v1758_v22 }
  0xcc   : > { %v438_v33 = vand.u32 2147483647, %v1762_v28  ;;  %v449_v40 = vmul.f32 %v445_v38, %v412_v37  ;;  %v1473_v38 = vld [vmem:[%s2205_s6] ss:$0 sm:$0xff] }
  0xcd   : > { %vm440_vm4 = vcmp.eq.f32.partialorder %v436_v29, inf  ;;  %725 = vperm.xlu0 %1753, %v447_v30  }
  0xce   : > { %v444_v36 = vsel %vm440_vm4, 0.0, %v1760_v26  ;;  %vm442_vm5 = vcmp.eq.f32.partialorder %v438_v33, inf }
  0xcf   : > { %v448_v39 = vmul.f32 %v444_v36, %v411_v32  ;;  %v446_v42 = vsel %vm442_vm5, 0.0, %v1762_v28 }
  0xd0   : > { %v450_v43 = vmul.f32 %v446_v42, %v413_v41 }
  0xd1   : > { %730 = vperm.xlu1 %1754, %v448_v39  }
  0xd5   : > { %735 = vperm.xlu1 %1754, %v449_v40  }
  0xd9   : > { %740 = vperm.xlu1 %1754, %v450_v43  }
  0xec   : > { %v1576_v45 = vpop.f32.mrf.mxu0 }
  0xed   : > { %v548_v46 = vadd.f32 %v1576_v45, %v1464_v44 }
  0xee   : > { %v542_v47 = vpop.f32.mrf.mxu0 }
  0xef   : > { %v543_v48 = vadd.f32 %v1464_v44, %v542_v47  ;;  %1580 = vmatprep.subr.mxu1 %v548_v46  ;;  %v1064_v47 = vld [vmem:[#allocation2 + $0x78] sm:$0xff] }
  0xf0   : > { %v1579_v49 = vpop.f32.mrf.mxu0  ;;  %1581 = vmatpush3.msra.mxu1 %v548_v46 }
  0xf1   : > { %v558_v50 = vadd.f32 %v1579_v49, %v1464_v44  ;;  %1582 = vmatprep.subr.mxu1 %v543_v48  ;;  %v1062_v49 = vld [vmem:[#allocation2 + $0x68] sm:$0xff] }
  0xf2   : > { %v552_v51 = vpop.f32.mrf.mxu0  ;;  %1583 = vmatpush3.msra.mxu1 %v543_v48  ;;  %v1063_v48 = vld [vmem:[#allocation2 + $0x70] sm:$0xff] }
  0xf3   : > { %v553_v52 = vadd.f32 %v1464_v44, %v552_v51  ;;  %1585 = vmatmul.mubr.msk.f32.vlgmr.msra.gmra.mxu1 %vm414_vm1, %v2021_v6  ;;  %1587 = vmatprep.subr.mxu1 %v558_v50  ;;  %v1060_v51 = vld [vmem:[#allocation2 + $0x58] sm:$0xff] }
  0xf4   : > { %1588 = vmatpush3.msra.mxu1 %v558_v50  ;;  %1591 = vmatprep.mubr.msk.f32.mxu1 %vm414_vm1, %v2024_v8  ;;  %v1061_v50 = vld [vmem:[#allocation2 + $0x60] sm:$0xff] }
  0xf5   : > { %1589 = vmatprep.subr.mxu1 %v553_v52 }
  0xf6   : > { %1590 = vmatpush3.msra.mxu1 %v553_v52  ;;  %v1058_v52 = vld [vmem:[#allocation2 + $0x48] sm:$0xff] }
  0xf7   : > { %1592 = vmatmul.mubr.msk.f32.vlgmr.msra.gmra.mxu1 %vm414_vm1, %v2026_v9 }
  0xf8   : > { %1643 = vmatprep.mubr.msk.f32.mxu1 %vm414_vm1, %v2024_v8 }
 0x148   : > { %v2115_v10 = vpop.permute.xlu0 %725 }
 0x14c   : > { %v2110_v2 = vpop.permute.xlu1 %730 }
 0x150   : > { %v2112_v3 = vpop.permute.xlu1 %735 }
 0x154   : > { %v2118_v14 = vpop.permute.xlu1 %740 }
 0x1b3   : > { %v1586_v4 = vpop.f32.mrf.mxu1 }
 0x1b4   : > { %v744_v7 = vmul.f32 %v1586_v4, %v2110_v2 }
 0x1b5   : > { %v633_v11 = vpop.f32.mrf.mxu1 }
 0x1b6   : > { %v752_v12 = vmul.f32 0.70710677, %v744_v7  ;;  %v743_v13 = vmul.f32 %v2115_v10, %v633_v11  ;;  %v748_v28 = vmul.f32 0.5, %v744_v7 }
 0x1b7   : > { %v1593_v15 = vpop.f32.mrf.mxu1 }
 0x1b8   : > { %1763 = verf.f32 %v752_v12  ;;  %v751_v16 = vmul.f32 0.70710677, %v743_v13  ;;  %v746_v17 = vmul.f32 %v1593_v15, %v2118_v14  ;;  %v747_v25 = vmul.f32 0.5, %v743_v13 }
 0x1b9   : > { %v714_v18 = vpop.f32.mrf.mxu1 }
 0x1ba   : > { %1765 = verf.f32 %v751_v16  ;;  %v754_v19 = vmul.f32 0.70710677, %v746_v17  ;;  %v745_v20 = vmul.f32 %v2112_v3, %v714_v18  ;;  %v750_v35 = vmul.f32 0.5, %v746_v17 }
 0x1bc   : > { %1767 = verf.f32 %v754_v19  ;;  %v753_v21 = vmul.f32 0.70710677, %v745_v20  ;;  %v749_v33 = vmul.f32 0.5, %v745_v20 }
 0x1be   : > { %1769 = verf.f32 %v753_v21 }
 0x1c5   : > { %v1764_v22 = vpop.eup %1763 }
 0x1c6   : > { %v760_v24 = vadd.f32 1.0, %v1764_v22 }
 0x1c7   : > { %v1766_v23 = vpop.eup %1765 }
 0x1c8   : > { %v759_v26 = vadd.f32 1.0, %v1766_v23  ;;  %v764_v31 = vmul.f32 %v760_v24, %v748_v28 }
 0x1c9   : > { %v1768_v27 = vpop.eup %1767 }
 0x1ca   : > { %v763_v29 = vmul.f32 %v759_v26, %v747_v25  ;;  %v762_v32 = vadd.f32 1.0, %v1768_v27 }
 0x1cb   : > { %v1770_v30 = vpop.eup %1769 }
 0x1cc   : > { %1626 = vmatprep.mubr.f32.mxu0 %v763_v29  ;;  %v761_v34 = vadd.f32 1.0, %v1770_v30  ;;  %v766_v37 = vmul.f32 %v762_v32, %v750_v35 }
 0x1cd   : > { %1627 = vmatmul.mubr.f32.vlgmr.msra.gmra.mxu0 %v764_v31 }
 0x1ce   : > { %v765_v36 = vmul.f32 %v761_v34, %v749_v33  ;;  %v1478_v34 = vld [vmem:[%s2207_s8] ss:$0 sm:$0xff] }
 0x1d0   : > { %1629 = vmatprep.mubr.f32.mxu0 %v765_v36 }
 0x1d1   : > { %1630 = vmatmul.mubr.f32.gmra.mxu0 %v766_v37 }
 0x1d2   : > { %1636 = vmatprep.mubr.msk.f32.mxu0 %vm414_vm1, %v2019_v5 }
 0x28d   : > { %v1628_v39 = vpop.f32.mrf.mxu0 }
 0x28e   : > { %v862_v40 = vadd.f32 %v1628_v39, %v1473_v38 }
 0x28f   : > { %v856_v41 = vpop.f32.mrf.mxu0 }
 0x290   : > { %v857_v42 = vadd.f32 %v1473_v38, %v856_v41  ;;  %1632 = vmatprep.subr.mxu0 %v862_v40 }
 0x291   : > { %v1631_v43 = vpop.f32.mrf.mxu0  ;;  %1633 = vmatpush3.msra.mxu0 %v862_v40 }
 0x292   : > { %v872_v44 = vadd.f32 %v1631_v43, %v1473_v38  ;;  %1634 = vmatprep.subr.mxu0 %v857_v42 }
 0x293   : > { %v866_v45 = vpop.f32.mrf.mxu0  ;;  %1635 = vmatpush3.msra.mxu0 %v857_v42 }
 0x294   : > { %v867_v46 = vadd.f32 %v1473_v38, %v866_v45  ;;  %1637 = vmatmul.mubr.msk.f32.vlgmr.msra.gmra.mxu0 %vm414_vm1, %v2021_v6  ;;  %1639 = vmatprep.subr.mxu1 %v872_v44 }
 0x295   : > { %1640 = vmatpush3.msra.mxu1 %v872_v44  ;;  %1688 = vmatprep.mubr.msk.f32.mxu0 %vm414_vm1, %v2019_v5  ;;  %v1059_v5 = vld [vmem:[#allocation2 + $0x50] sm:$0xff] }
 0x296   : > { %1641 = vmatprep.subr.mxu1 %v867_v46 }
 0x297   : > { %1642 = vmatpush3.msra.mxu1 %v867_v46 }
 0x298   : > { %1644 = vmatmul.mubr.msk.f32.vlgmr.msra.gmra.mxu1 %vm414_vm1, %v2026_v9  ;;  %1646 = vmatprep.subr.mxu1 %v1064_v47 }
 0x299   : > { %1647 = vmatpush3.msra.mxu1 %v1064_v47 }
 0x29a   : > { %1648 = vmatprep.subr.mxu1 %v1063_v48 }
 0x29b   : > { %1649 = vmatpush3.msra.mxu1 %v1063_v48 }
 0x29c   : > { %1650 = vmatprep.subr.mxu1 %v1062_v49 }
 0x29d   : > { %1651 = vmatpush3.msra.mxu1 %v1062_v49 }
 0x29e   : > { %1652 = vmatprep.subr.mxu1 %v1061_v50 }
 0x29f   : > { %1653 = vmatpush3.msra.mxu1 %v1061_v50 }
 0x2a0   : > { %1654 = vmatprep.subr.mxu1 %v1060_v51 }
 0x2a1   : > { %1655 = vmatpush3.msra.mxu1 %v1060_v51 }
 0x2a2   : > { %1656 = vmatprep.subr.mxu1 %v1059_v5 }
 0x2a3   : > { %1657 = vmatpush3.msra.mxu1 %v1059_v5 }
 0x2a4   : > { %1658 = vmatprep.subr.mxu1 %v1058_v52 }
 0x2a5   : > { %1659 = vmatpush3.msra.mxu1 %v1058_v52 }
 0x2a6   : > { %1660 = vmatprep.subr.mxu1 %v1057_v53 }
 0x2a7   : > { %1661 = vmatpush3.msra.mxu1 %v1057_v53 }
 0x2a8   : > { %1662 = vmatprep.subr.mxu1 %v1056_v54 }
 0x2a9   : > { %1663 = vmatpush3.msra.mxu1 %v1056_v54 }
 0x2aa   : > { %1664 = vmatprep.subr.mxu1 %v1055_v55 }
 0x2ab   : > { %1665 = vmatpush3.msra.mxu1 %v1055_v55 }
 0x2ac   : > { %1666 = vmatprep.subr.mxu1 %v1054_v56 }
 0x2ad   : > { %1667 = vmatpush3.msra.mxu1 %v1054_v56 }
 0x2ae   : > { %1668 = vmatprep.subr.mxu1 %v1053_v57 }
 0x2af   : > { %1669 = vmatpush3.msra.mxu1 %v1053_v57 }
 0x2b0   : > { %1670 = vmatprep.subr.mxu1 %v1052_v58 }
 0x2b1   : > { %1671 = vmatpush3.msra.mxu1 %v1052_v58 }
 0x2b2   : > { %1672 = vmatprep.subr.mxu1 %v1051_v59 }
 0x2b3   : > { %1673 = vmatpush3.msra.mxu1 %v1051_v59 }
 0x2b4   : > { %1674 = vmatprep.subr.mxu1 %v1050_v60 }
 0x2b5   : > { %1675 = vmatpush3.msra.mxu1 %v1050_v60 }
 0x2b6   : > { %1676 = vmatprep.subr.mxu1 %v1049_v61 }
 0x2b7   : > { %1677 = vmatpush3.msra.mxu1 %v1049_v61 }
 0x354   : > { %v1638_v62 = vpop.f32.mrf.mxu0 }
 0x355   : > { %v1026_v63 = vmul.f32 %v1638_v62, %v2110_v2 }
 0x356   : > { %v941_v0 = vpop.f32.mrf.mxu0 }
 0x357   : > { %v1034_v1 = vmul.f32 0.70710677, %v1026_v63  ;;  %v1025_v4 = vmul.f32 %v941_v0, %v2115_v10  ;;  %v1030_v24 = vmul.f32 0.5, %v1026_v63 }
 0x358   : > { %v1645_v7 = vpop.f32.mrf.mxu1 }
 0x359   : > { %1771 = verf.f32 %v1034_v1  ;;  %v1033_v11 = vmul.f32 0.70710677, %v1025_v4  ;;  %v1028_v12 = vmul.f32 %v1645_v7, %v2118_v14  ;;  %v1029_v21 = vmul.f32 0.5, %v1025_v4 }
 0x35a   : > { %v1016_v13 = vpop.f32.mrf.mxu1 }
 0x35b   : > { %1773 = verf.f32 %v1033_v11  ;;  %v1036_v15 = vmul.f32 0.70710677, %v1028_v12  ;;  %v1027_v16 = vmul.f32 %v1016_v13, %v2112_v3  ;;  %v1032_v31 = vmul.f32 0.5, %v1028_v12 }
 0x35d   : > { %1775 = verf.f32 %v1036_v15  ;;  %v1035_v17 = vmul.f32 0.70710677, %v1027_v16  ;;  %v1031_v29 = vmul.f32 0.5, %v1027_v16 }
 0x35f   : > { %1777 = verf.f32 %v1035_v17 }
 0x366   : > { %v1772_v18 = vpop.eup %1771 }
 0x367   : > { %v1042_v20 = vadd.f32 1.0, %v1772_v18 }
 0x368   : > { %v1774_v19 = vpop.eup %1773 }
 0x369   : > { %v1041_v22 = vadd.f32 1.0, %v1774_v19  ;;  %v1046_v27 = vmul.f32 %v1042_v20, %v1030_v24 }
 0x36a   : > { %v1776_v23 = vpop.eup %1775 }
 0x36b   : > { %v1045_v25 = vmul.f32 %v1041_v22, %v1029_v21  ;;  %v1044_v28 = vadd.f32 1.0, %v1776_v23 }
 0x36c   : > { %v1778_v26 = vpop.eup %1777 }
 0x36d   : > { %1678 = vmatprep.mubr.f32.mxu1 %v1045_v25  ;;  %v1043_v30 = vadd.f32 1.0, %v1778_v26  ;;  %v1048_v33 = vmul.f32 %v1044_v28, %v1032_v31 }
 0x36e   : > { %1679 = vmatmul.mubr.f32.vlgmr.msra.gmra.mxu1 %v1046_v27 }
 0x36f   : > { %v1047_v32 = vmul.f32 %v1043_v30, %v1031_v29 }
 0x371   : > { %1681 = vmatprep.mubr.f32.mxu1 %v1047_v32 }
 0x372   : > { %1682 = vmatmul.mubr.f32.gmra.mxu1 %v1048_v33 }
 0x42e   : > { %v1680_v35 = vpop.f32.mrf.mxu1 }
 0x42f   : > { %v1144_v36 = vadd.f32 %v1680_v35, %v1478_v34 }
 0x430   : > { %v1138_v37 = vpop.f32.mrf.mxu1 }
 0x431   : > { %v1139_v38 = vadd.f32 %v1478_v34, %v1138_v37  ;;  %1684 = vmatprep.subr.mxu0 %v1144_v36 }
 0x432   : > { %v1683_v39 = vpop.f32.mrf.mxu1  ;;  %1685 = vmatpush3.msra.mxu0 %v1144_v36 }
 0x433   : > { %v1154_v40 = vadd.f32 %v1683_v39, %v1478_v34  ;;  %1686 = vmatprep.subr.mxu0 %v1139_v38 }
 0x434   : > { %v1148_v41 = vpop.f32.mrf.mxu1  ;;  %1687 = vmatpush3.msra.mxu0 %v1139_v38 }
 0x435   : > { %v1149_v42 = vadd.f32 %v1478_v34, %v1148_v41  ;;  %1689 = vmatmul.mubr.msk.f32.vlgmr.msra.gmra.mxu0 %vm414_vm1, %v2021_v6  ;;  %1691 = vmatprep.subr.mxu0 %v1154_v40 }
 0x436   : > { %1692 = vmatpush3.msra.mxu0 %v1154_v40  ;;  %1695 = vmatprep.mubr.msk.f32.mxu0 %vm414_vm1, %v2024_v8 }
 0x437   : > { %1693 = vmatprep.subr.mxu0 %v1149_v42 }
 0x438   : > { %1694 = vmatpush3.msra.mxu0 %v1149_v42 }
 0x439   : > { %1696 = vmatmul.mubr.msk.f32.vlgmr.msra.gmra.mxu0 %vm414_vm1, %v2026_v9 }
 0x4f5   : > { %v1690_v43 = vpop.f32.mrf.mxu0 }
 0x4f6   : > { %v1308_v44 = vmul.f32 %v1690_v43, %v2110_v2 }
 0x4f7   : > { %v1223_v45 = vpop.f32.mrf.mxu0 }
 0x4f8   : > { %v1316_v46 = vmul.f32 0.70710677, %v1308_v44  ;;  %v1307_v47 = vmul.f32 %v1223_v45, %v2115_v10  ;;  %v1312_v5 = vmul.f32 0.5, %v1308_v44 }
 0x4f9   : > { %v1697_v48 = vpop.f32.mrf.mxu0 }
 0x4fa   : > { %1779 = verf.f32 %v1316_v46  ;;  %v1315_v6 = vmul.f32 0.70710677, %v1307_v47  ;;  %v1310_v49 = vmul.f32 %v1697_v48, %v2118_v14  ;;  %v1311_v54 = vmul.f32 0.5, %v1307_v47 }
 0x4fb   : > { %v1298_v50 = vpop.f32.mrf.mxu0 }
 0x4fc   : > { %1781 = verf.f32 %v1315_v6  ;;  %v1318_v8 = vmul.f32 0.70710677, %v1310_v49  ;;  %v1309_v51 = vmul.f32 %v1298_v50, %v2112_v3  ;;  %v1314_v57 = vmul.f32 0.5, %v1310_v49 }
 0x4fe   : > { %1783 = verf.f32 %v1318_v8  ;;  %v1317_v9 = vmul.f32 0.70710677, %v1309_v51  ;;  %v1313_v60 = vmul.f32 0.5, %v1309_v51 }
 0x500   : > { %1785 = verf.f32 %v1317_v9 }
 0x507   : > { %v1780_v2 = vpop.eup %1779 }
 0x508   : > { %v1324_v52 = vadd.f32 1.0, %v1780_v2 }
 0x509   : > { %v1782_v10 = vpop.eup %1781 }
 0x50a   : > { %v1328_v53 = vmul.f32 %v1324_v52, %v1312_v5  ;;  %v1323_v55 = vadd.f32 1.0, %v1782_v10 }
 0x50b   : > { %v1784_v56 = vpop.eup %1783 }
 0x50c   : > { %1332 = vst [vmem:[%s379_s14 + $0x8] sm:$0xff] %v1328_v53  ;;  %v1327_v14 = vmul.f32 %v1323_v55, %v1311_v54  ;;  %v1326_v3 = vadd.f32 1.0, %v1784_v56 }
 0x50d   : > { %v1786_v58 = vpop.eup %1785 }
 0x50e   : > { %1331 = vst [vmem:[%s379_s14] sm:$0xff] %v1327_v14  ;;  %v1330_v59 = vmul.f32 %v1326_v3, %v1314_v57  ;;  %v1325_v61 = vadd.f32 1.0, %v1786_v58 }
 0x510   : > { %1334 = vst [vmem:[%s379_s14 + $0x18] sm:$0xff] %v1330_v59  ;;  %v1329_v62 = vmul.f32 %v1325_v61, %v1313_v60 }
 0x512   : > { %1333 = vst [vmem:[%s379_s14 + $0x10] sm:$0xff] %v1329_v62 }
 0x513   : > { %1826 = shalt.err (!%p1823_p0)
}
 0x514   : > { %s1827_s29 = scalar_lea.hbm %s2157_s28, 512  ;;  %s1831_s25 = scalar_lea.hbm %s2208_s9, 1024 }
 0x515   : > { %p1828_p1 = scmp.ne.s32.totalorder %s2157_s28, %s1827_s29  ;;  %p1832_p4 = scmp.lt.s32.totalorder %s2157_s28, %s2208_s9 }
 0x516   : > { %p1833_p7 = scmp.lt.s32.totalorder %s1831_s25, %s1827_s29 }
 0x517   : > { %p1829_p2 = pnand %p1828_p1, %p1974_p5 }
 0x518   : > { %p1834_p8 = por %p1833_p7, %p1832_p4 }
 0x519   : > { %p1830_p3 = pneg %p1829_p2 }
 0x51b   : > { %p1835_p6 = pnand %p1834_p8, %p1830_p3 }
 0x51d   : > { %1838 = shalt.err (!%p1835_p6)
}
 0x51e   : > { %s1884_s13 = smov 128   ;;  %s1885_s17 = smov 8  }
 0x51f   : > { %1702 = dma.vmem_to_hbm [thread:$0]  (%p1974_p5), %s2152_s24, 512, %s2157_s28, %s2159_s16, %s1884_s13, %s1884_s13, %s1885_s17  }
 0x520 PF: > { %p1714_p9 = scmp.ge.s32.totalorder %s1877_s12, 2  ;;  %s1365_s21 = sand.u32 1, %s1865_s30  }
 0x521   : > { %p2214_p10 = scmp.ne.s32.totalorder %s2210_s20, 0  ;;  %s1366_s22 = scalar_lea.sflag [#allocation4], %s1365_s21 }
 0x523   : > { %p1709_p11 = pnand %p1714_p9, %p2214_p10 }
 0x525   : > { %p1710_p12 = pneg %p1709_p11 }
 0x527   : > { %1860 = dma.done.wait (%p1710_p12), %s1366_s22, 512  }
 0x528   : > { %1862 = vsyncadd (%p1710_p12), %s1366_s22, 4294966784  ;;  %p20_p13 = scmp.ge.s32.totalorder %s1961_s15, 4   ;;  %s2215_s30 = smov %s1869_s10 }
 0x529   : > { %s2216_s10 = smov %s1873_s11  ;;  %s2217_s11 = smov %s1972_s18 }
 0x52a   : > { %s2218_s12 = smov %s1961_s15  ;;  %22 = sbr.rel (!%p20_p13) target bundleno = 4 (0x4), region = 102 }
 0x52f   :  { %1371 = vsyncpa [#allocation3], 1 }
 0x530   :  { %1373 = vsyncpa [#allocation3 + $0x1], 1 }
 0x531   :  { %1374 = vsyncpa [#allocation4], 1 }
 0x532   :  { %1376 = vsyncpa [#allocation4 + $0x1], 1 }

</bundles_post_ra>
